<compile_context>
chip_gen: v6e
topology: v6e:2x2x1
jax: 0.10.0
libtpu: 0.0.40
codegen_flags: <defaults>
</compile_context>

<pallas_src>
import jax
import jax.numpy as jnp
from jax import lax
from jax.experimental import pallas as pl
from jax.experimental.pallas import tpu as pltpu


def mlp_kernel(x_ref, w1_ref, b1_ref, w2_ref, b2_ref, w3_ref, b3_ref, o_ref):
    # x_ref: [block_b, D] f32, natural layout (batch on sublanes).
    # Cast to bf16 on the VPU right before the MXU; streaming f32 from HBM and
    # casting here is cheaper than a standalone wrapper-side astype pass.
    x_bf = x_ref[...].astype(jnp.bfloat16)

    # fc1 + ReLU  (dropout1 is identity at inference).
    # Contract on D (rhs dim 1) so the result is [N1, block_b]: batch moves to
    # lanes and all downstream intermediates / the final store are lane-dense.
    h1 = lax.dot_general(
        w1_ref[...], x_bf,
        dimension_numbers=(((1,), (1,)), ((), ())),
        preferred_element_type=jnp.float32)
    h1 = jnp.maximum(h1 + b1_ref[...], 0.0)                     # [N1, block_b] f32

    # fc2 + ReLU  (dropout2 is identity at inference).
    h2 = jnp.dot(w2_ref[...], h1.astype(w2_ref.dtype),
                 preferred_element_type=jnp.float32)
    h2 = jnp.maximum(h2 + b2_ref[...], 0.0)                     # [N2, block_b] f32

    # fc3: [N2] -> 1 as VPU multiply + sublane (XLU) reduce -> lane-dense row.
    out = jnp.sum(h2 * w3_ref[...], axis=0, keepdims=True) + b3_ref[...]
    o_ref[...] = out.astype(o_ref.dtype)                        # [1, block_b]
    # TODO(synk): training-mode dropout (random mask + 1/(1-p) scaling) not
    # implemented; forward matches PyTorch eval() semantics.


def _round_up(v, m):
    return ((v + m - 1) // m) * m


def mlp_forward(x, params, *, block_b=None):
    """Fused MLP forward. x: [B, D] float32, returns [B, 1] float32."""
    w1, b1, w2, b2, w3, b3 = params
    B, D = x.shape
    N1 = w1.shape[1]
    N2 = w2.shape[1]

    if block_b is None:
        # Large lane-dense batch tile (multiple of 128, up to 8192).  Amortizes
        # the ~0.35 us per-grid-step overhead; VMEM footprint at 8192 is only a
        # few MiB (x tile double-buffered + f32 h1/h2), fine on all generations.
        block_b = min(8192, _round_up(B, 128))

    grid = (pl.cdiv(B, block_b),)   # partial last block; no jnp.pad over x

    # Only the tiny weights get wrapper-side layout/cast work.  x goes straight
    # to the kernel — no extra HBM transpose / cast / pad passes over the big
    # tensor.
    w1t = w1.T.astype(jnp.bfloat16)                   # [N1, D]
    w2t = w2.T.astype(jnp.bfloat16)                   # [N2, N1]
    b1c = b1.reshape(N1, 1).astype(jnp.float32)       # column biases, f32
    b2c = b2.reshape(N2, 1).astype(jnp.float32)
    w3c = w3.reshape(N2, 1).astype(jnp.float32)       # fc3 runs on the VPU, f32
    b3c = b3.reshape(1, 1).astype(jnp.float32)

    out_t = pl.pallas_call(
        mlp_kernel,
        out_shape=jax.ShapeDtypeStruct((1, B), jnp.float32),
        grid_spec=pltpu.PrefetchScalarGridSpec(
            num_scalar_prefetch=0,
            grid=grid,
            in_specs=[
                pl.BlockSpec((block_b, D), lambda i: (i, 0)),   # x tile (streamed)
                pl.BlockSpec((N1, D), lambda i: (0, 0)),        # w1^T (resident)
                pl.BlockSpec((N1, 1), lambda i: (0, 0)),        # b1
                pl.BlockSpec((N2, N1), lambda i: (0, 0)),       # w2^T
                pl.BlockSpec((N2, 1), lambda i: (0, 0)),        # b2
                pl.BlockSpec((N2, 1), lambda i: (0, 0)),        # w3
                pl.BlockSpec((1, 1), lambda i: (0, 0)),         # b3
            ],
            out_specs=pl.BlockSpec((1, block_b), lambda i: (0, i)),
        ),
        compiler_params=pltpu.CompilerParams(
            # Batch tiles are fully independent.  On v7x, switching this to
            # pltpu.CORE_PARALLEL shards the tiles across both TensorCores;
            # PARALLEL is kept as the portable default (single TC on v5e/v6e).
            dimension_semantics=(pltpu.PARALLEL,),
            # Raised above v5e's 16 MiB default so large batch tiles fit;
            # kept <= 48 MiB to leave headroom inside v7x's 64 MiB physical.
            vmem_limit_bytes=48 * 1024 * 1024,
        ),
    )(x, w1t, b1c, w2t, b2c, w3c, b3c)

    # [1, B] lane-dense slab -> [B, 1]  (row-major reshape, no data movement)
    return out_t.reshape(B, 1)


def init_params(key, input_dim, neurons=64):
    """Deterministic synthetic parameters with the same shapes as the module."""
    n2 = neurons // 2
    ks = jax.random.split(key, 6)
    # stored as [in, out]; biases as [1, out] (transpose of PyTorch's [out, in])
    w1 = jax.random.normal(ks[0], (input_dim, neurons), jnp.float32) * 0.1
    b1 = jax.random.normal(ks[1], (1, neurons), jnp.float32) * 0.1
    w2 = jax.random.normal(ks[2], (neurons, n2), jnp.float32) * 0.1
    b2 = jax.random.normal(ks[3], (1, n2), jnp.float32) * 0.1
    w3 = jax.random.normal(ks[4], (n2, 1), jnp.float32) * 0.1
    b3 = jax.random.normal(ks[5], (1, 1), jnp.float32) * 0.1
    return (w1, b1, w2, b2, w3, b3)


def mlp_reference(x, params):
    """Pure-JAX f32 reference for correctness check."""
    w1, b1, w2, b2, w3, b3 = params
    h1 = jnp.maximum(x @ w1 + b1, 0.0)
    h2 = jnp.maximum(h1 @ w2 + b2, 0.0)
    return h2 @ w3 + b3


if __name__ == "__main__":
    key = jax.random.PRNGKey(0)
    k_x, k_p = jax.random.split(key)

    batch, input_dim, neurons = 8, 32, 64
    x = jax.random.normal(k_x, (batch, input_dim), jnp.float32)
    params = init_params(k_p, input_dim, neurons)

    out = mlp_forward(x, params)
    out = jax.block_until_ready(out)

    ref = mlp_reference(x, params)
    assert out.shape == (batch, 1), out.shape
    # bf16 weights / x on the matmul path -> looser tolerance than pure f32.
    assert jnp.allclose(out, ref, atol=2e-2, rtol=2e-2), (out, ref)
    print("KERNEL_OK")
</pallas_src>

<mosaic_0001>
module attributes {stable_mosaic.version = 11 : i64} {
  func.func @mlp_kernel(%arg0: i32, %arg1: memref<128x32xf32, #tpu.memory_space<vmem>>, %arg2: memref<64x32xbf16, #tpu.memory_space<vmem>>, %arg3: memref<64x1xf32, #tpu.memory_space<vmem>>, %arg4: memref<32x64xbf16, #tpu.memory_space<vmem>>, %arg5: memref<32x1xf32, #tpu.memory_space<vmem>>, %arg6: memref<32x1xf32, #tpu.memory_space<vmem>>, %arg7: memref<1x1xf32, #tpu.memory_space<vmem>>, %arg8: memref<1x128xf32, #tpu.memory_space<vmem>>) attributes {dimension_semantics = [#tpu.dimension_semantics<parallel>], iteration_bounds = array<i64: 1>, scalar_prefetch = 0 : i64, scratch_operands = 0 : i64, tpu.core_type = #tpu.core_type<tc>, window_params = [{transform_indices = @transform_0, window_bounds = array<i64: 128, 32>}, {pipeline_mode = #tpu.pipeline_mode<synchronous>, transform_indices = @transform_1, window_bounds = array<i64: 64, 32>}, {pipeline_mode = #tpu.pipeline_mode<synchronous>, transform_indices = @transform_2, window_bounds = array<i64: 64, 1>}, {pipeline_mode = #tpu.pipeline_mode<synchronous>, transform_indices = @transform_3, window_bounds = array<i64: 32, 64>}, {pipeline_mode = #tpu.pipeline_mode<synchronous>, transform_indices = @transform_4, window_bounds = array<i64: 32, 1>}, {pipeline_mode = #tpu.pipeline_mode<synchronous>, transform_indices = @transform_5, window_bounds = array<i64: 32, 1>}, {pipeline_mode = #tpu.pipeline_mode<synchronous>, transform_indices = @transform_6, window_bounds = array<i64: 1, 1>}, {transform_indices = @transform_7, window_bounds = array<i64: 1, 128>}]} {
    %c0 = arith.constant 0 : index
    %c0_0 = arith.constant 0 : index
    %0 = vector.load %arg1[%c0, %c0_0] : memref<128x32xf32, #tpu.memory_space<vmem>>, vector<128x32xf32>
    %1 = arith.truncf %0 : vector<128x32xf32> to vector<128x32xbf16>
    %c0_1 = arith.constant 0 : index
    %c0_2 = arith.constant 0 : index
    %2 = vector.load %arg2[%c0_1, %c0_2] : memref<64x32xbf16, #tpu.memory_space<vmem>>, vector<64x32xbf16>
    %cst = arith.constant dense<0.000000e+00> : vector<64x128xf32>
    %3 = tpu.matmul %2, %1, %cst {dimension_numbers = #tpu.dot_dimension_numbers<[1], [1], [0], [0], [0, 0, 1, 0], [], []>} : vector<64x32xbf16>, vector<128x32xbf16>, vector<64x128xf32> -> vector<64x128xf32>
    %c0_3 = arith.constant 0 : index
    %c0_4 = arith.constant 0 : index
    %4 = vector.load %arg3[%c0_3, %c0_4] : memref<64x1xf32, #tpu.memory_space<vmem>>, vector<64x1xf32>
    %5 = vector.broadcast %4 : vector<64x1xf32> to vector<64x128xf32>
    %6 = arith.addf %3, %5 : vector<64x128xf32>
    %cst_5 = arith.constant 0.000000e+00 : f32
    %7 = vector.broadcast %cst_5 : f32 to vector<64x128xf32>
    %8 = arith.maximumf %6, %7 : vector<64x128xf32>
    %c0_6 = arith.constant 0 : index
    %c0_7 = arith.constant 0 : index
    %9 = vector.load %arg4[%c0_6, %c0_7] : memref<32x64xbf16, #tpu.memory_space<vmem>>, vector<32x64xbf16>
    %10 = arith.truncf %8 : vector<64x128xf32> to vector<64x128xbf16>
    %cst_8 = arith.constant dense<0.000000e+00> : vector<32x128xf32>
    %11 = tpu.matmul %9, %10, %cst_8 {dimension_numbers = #tpu.dot_dimension_numbers<[1], [0], [0], [1], [0, 0, 1, 1], [], []>} : vector<32x64xbf16>, vector<64x128xbf16>, vector<32x128xf32> -> vector<32x128xf32>
    %c0_9 = arith.constant 0 : index
    %c0_10 = arith.constant 0 : index
    %12 = vector.load %arg5[%c0_9, %c0_10] : memref<32x1xf32, #tpu.memory_space<vmem>>, vector<32x1xf32>
    %13 = vector.broadcast %12 : vector<32x1xf32> to vector<32x128xf32>
    %14 = arith.addf %11, %13 : vector<32x128xf32>
    %cst_11 = arith.constant 0.000000e+00 : f32
    %15 = vector.broadcast %cst_11 : f32 to vector<32x128xf32>
    %16 = arith.maximumf %14, %15 : vector<32x128xf32>
    %c0_12 = arith.constant 0 : index
    %c0_13 = arith.constant 0 : index
    %17 = vector.load %arg6[%c0_12, %c0_13] : memref<32x1xf32, #tpu.memory_space<vmem>>, vector<32x1xf32>
    %18 = vector.broadcast %17 : vector<32x1xf32> to vector<32x128xf32>
    %19 = arith.mulf %16, %18 : vector<32x128xf32>
    %cst_14 = arith.constant dense<0.000000e+00> : vector<128xf32>
    %20 = vector.multi_reduction <add>, %19, %cst_14 [0] : vector<32x128xf32> to vector<128xf32>
    %21 = vector.shape_cast %20 : vector<128xf32> to vector<1x128xf32>
    %c0_15 = arith.constant 0 : index
    %c0_16 = arith.constant 0 : index
    %22 = vector.load %arg7[%c0_15, %c0_16] : memref<1x1xf32, #tpu.memory_space<vmem>>, vector<1x1xf32>
    %23 = vector.broadcast %22 : vector<1x1xf32> to vector<1x128xf32>
    %24 = arith.addf %21, %23 : vector<1x128xf32>
    %c0_17 = arith.constant 0 : index
    %c0_18 = arith.constant 0 : index
    %25 = vector.load %arg8[%c0_17, %c0_18] : memref<1x128xf32, #tpu.memory_space<vmem>>, vector<1x128xf32>
    tpu.vector_store %arg8[%c0_17, %c0_18], %24 {strides = array<i32>} : memref<1x128xf32, #tpu.memory_space<vmem>>, vector<1x128xf32>,
    return
  }
  func.func @transform_0(%arg0: i32) -> (i32, i32) {
    %c0_i32 = arith.constant 0 : i32
    %c0_i32_0 = arith.constant 0 : i32
    return %arg0, %c0_i32 : i32, i32
  }
  func.func @transform_1(%arg0: i32) -> (i32, i32) {
    %c0_i32 = arith.constant 0 : i32
    %c0_i32_0 = arith.constant 0 : i32
    %c0_i32_1 = arith.constant 0 : i32
    return %c0_i32, %c0_i32_0 : i32, i32
  }
  func.func @transform_2(%arg0: i32) -> (i32, i32) {
    %c0_i32 = arith.constant 0 : i32
    %c0_i32_0 = arith.constant 0 : i32
    %c0_i32_1 = arith.constant 0 : i32
    return %c0_i32, %c0_i32_0 : i32, i32
  }
  func.func @transform_3(%arg0: i32) -> (i32, i32) {
    %c0_i32 = arith.constant 0 : i32
    %c0_i32_0 = arith.constant 0 : i32
    %c0_i32_1 = arith.constant 0 : i32
    return %c0_i32, %c0_i32_0 : i32, i32
  }
  func.func @transform_4(%arg0: i32) -> (i32, i32) {
    %c0_i32 = arith.constant 0 : i32
    %c0_i32_0 = arith.constant 0 : i32
    %c0_i32_1 = arith.constant 0 : i32
    return %c0_i32, %c0_i32_0 : i32, i32
  }
  func.func @transform_5(%arg0: i32) -> (i32, i32) {
    %c0_i32 = arith.constant 0 : i32
    %c0_i32_0 = arith.constant 0 : i32
    %c0_i32_1 = arith.constant 0 : i32
    return %c0_i32, %c0_i32_0 : i32, i32
  }
  func.func @transform_6(%arg0: i32) -> (i32, i32) {
    %c0_i32 = arith.constant 0 : i32
    %c0_i32_0 = arith.constant 0 : i32
    %c0_i32_1 = arith.constant 0 : i32
    return %c0_i32, %c0_i32_0 : i32, i32
  }
  func.func @transform_7(%arg0: i32) -> (i32, i32) {
    %c0_i32 = arith.constant 0 : i32
    %c0_i32_0 = arith.constant 0 : i32
    return %c0_i32, %arg0 : i32, i32
  }
}

</mosaic_0001>

<bundles_post_ra>
// kernel: tpu_custom_call.1
= control target key start
LH: loop header
LB: loop body
LE: loop exit
PB: predicated region body
PF: predicated region fallthrough
CT: control target
= control target key end

     0   :  { %s695_s0 = inlined_call_operand.vmem [shape: f32[8,32], index: 0, kind: input, shape index: {}]   ;;  %s696_s1 = inlined_call_operand.vmem [shape: bf16[64,32], index: 1, kind: input, shape index: {}]   ;;  %s697_s2 = inlined_call_operand.vmem [shape: f32[64,1], index: 2, kind: input, shape index: {}]   ;;  %s698_s3 = inlined_call_operand.vmem [shape: bf16[32,64], index: 3, kind: input, shape index: {}]   ;;  %s699_s4 = inlined_call_operand.vmem [shape: f32[32,1], index: 4, kind: input, shape index: {}]   ;;  %s700_s5 = inlined_call_operand.vmem [shape: f32[32,1], index: 5, kind: input, shape index: {}]   ;;  %s701_s6 = inlined_call_operand.<no memory space> [shape: f32[1,1], index: 6, kind: input, shape index: {}]   ;;  %s702_s7 = inlined_call_operand.hbm [shape: f32[1,8], index: 7, kind: output, shape index: {}]  }
   0x1   :  { %v12_v0 = vstv %s701_s6 }
   0x2   :  { %13 = vst [vmem:[#allocation2] sm:$0x1] %v12_v0 }
   0x3   :  { %v44_v1 = vld [vmem:[%s695_s0 + $0x70] sm:$0xff]  ;;  %v45_v2 = vld [vmem:[%s695_s0 + $0x78] sm:$0xff]  ;;  %vm130_vm0 = vcmask 261120   ;;  %v42_v3 = vld [vmem:[%s695_s0 + $0x60] sm:$0xff]  ;;  %v511_v6 = vmov 0  }
   0x4   :  { %v53_v4 = vpack.c.bf16 %v45_v2, %v44_v1  ;;  %v43_v5 = vld [vmem:[%s695_s0 + $0x68] sm:$0xff]  ;;  %481 = vset.pattern.permute.xlu0 %v511_v6  ;;  %482 = vset.pattern.permute.xlu1 %v511_v6  ;;  %v40_v9 = vld [vmem:[%s695_s0 + $0x50] sm:$0xff]  ;;  %v41_v10 = vld [vmem:[%s695_s0 + $0x58] sm:$0xff] }
   0x5   :  { %v52_v7 = vpack.c.bf16 %v43_v5, %v42_v3  ;;  %v483_v11 = vld [vmem:[%s696_s1] sm:$0xff]   ;;  %v51_v13 = vpack.c.bf16 %v41_v10, %v40_v9  ;;  %v68_v14 = vld [vmem:[%s697_s2 + $0x30] sm:$0xff]  ;;  %v69_v16 = vld [vmem:[%s697_s2 + $0x38] sm:$0xff] }
   0x6   :  { %471 = vmatprep.subr.msk.bf16.mxu0 %vm130_vm0, %v53_v4  ;;  %v165_v8 = vsel %vm130_vm0, %v53_v4, 0  ;;  %451 = vmatprep.mubr.msk.bf16.mxu0 %vm130_vm0, %v483_v11  ;;  %v66_v15 = vld [vmem:[%s697_s2 + $0x20] sm:$0xff]  ;;  %v67_v17 = vld [vmem:[%s697_s2 + $0x28] sm:$0xff]  ;;  %v64_v20 = vld [vmem:[%s697_s2 + $0x10] sm:$0xff] }
   0x7   :  { %436 = vmatpush3.bf16.xpose.msra.mxu0 %v165_v8  ;;  %v162_v12 = vsel %vm130_vm0, %v52_v7, 0  ;;  %102 = vperm.xlu0 %481, %v68_v14   ;;  %v38_v18 = vld [vmem:[%s695_s0 + $0x40] sm:$0xff]  ;;  %v39_v19 = vld [vmem:[%s695_s0 + $0x48] sm:$0xff]  ;;  %v65_v21 = vld [vmem:[%s697_s2 + $0x18] sm:$0xff] }
   0x8   :  { %472 = vmatprep.subr.msk.bf16.mxu0 %vm130_vm0, %v52_v7  ;;  %92 = vperm.xlu1 %482, %v66_v15  }
   0xb   :  { %107 = vperm.xlu0 %481, %v69_v16  }
   0xc   :  { %97 = vperm.xlu1 %482, %v67_v17  }
   0xf   :  { %438 = vmatpush3.bf16.xpose.msra.mxu0 %v162_v12 }
  0x10   :  { %473 = vmatprep.subr.msk.bf16.mxu0 %vm130_vm0, %v51_v13 }
  0x11   :  { %14 = vsyncpa [#allocation4], 0  ;;  %v159_v22 = vsel %vm130_vm0, %v51_v13, 0  ;;  %v50_v23 = vpack.c.bf16 %v39_v19, %v38_v18  ;;  %82 = vperm.xlu0 %481, %v64_v20   ;;  %v62_v24 = vld [vmem:[%s697_s2] sm:$0xff]  ;;  %87 = vperm.xlu1 %482, %v65_v21   ;;  %v63_v25 = vld [vmem:[%s697_s2 + $0x8] sm:$0xff]  ;;  %vm282_vm1 = vcmask 523264  }
  0x12   :  { %v36_v26 = vld [vmem:[%s695_s0 + $0x30] sm:$0xff]  ;;  %v37_v27 = vld [vmem:[%s695_s0 + $0x38] sm:$0xff]  ;;  %v248_v28 = vld [vmem:[%s699_s4] sm:$0xff] }
  0x13   :  { %v249_v29 = vld [vmem:[%s699_s4 + $0x8] sm:$0xff]  ;;  %v156_v30 = vsel %vm130_vm0, %v50_v23, 0  ;;  %v49_v31 = vpack.c.bf16 %v37_v27, %v36_v26  ;;  %v250_v32 = vld [vmem:[%s699_s4 + $0x10] sm:$0xff]  ;;  %v251_v33 = vld [vmem:[%s699_s4 + $0x18] sm:$0xff] }
  0x14   :  { %v34_v34 = vld [vmem:[%s695_s0 + $0x20] sm:$0xff]  ;;  %v35_v35 = vld [vmem:[%s695_s0 + $0x28] sm:$0xff]  ;;  %v344_v40 = vld [vmem:[%s700_s5 + $0x10] sm:$0xff] }
  0x15   :  { %72 = vperm.xlu0 %481, %v62_v24   ;;  %77 = vperm.xlu1 %482, %v63_v25   ;;  %v342_v36 = vld [vmem:[%s700_s5] sm:$0xff]  ;;  %v343_v37 = vld [vmem:[%s700_s5 + $0x8] sm:$0xff]  ;;  %v153_v38 = vsel %vm130_vm0, %v49_v31, 0  ;;  %v48_v39 = vpack.c.bf16 %v35_v35, %v34_v34  ;;  %v345_v41 = vld [vmem:[%s700_s5 + $0x18] sm:$0xff] }
  0x16   :  { %v32_v42 = vld [vmem:[%s695_s0 + $0x10] sm:$0xff]  ;;  %v33_v43 = vld [vmem:[%s695_s0 + $0x18] sm:$0xff]  ;;  %v379_v44 = vld [vmem:[#allocation2] sm:$0x1] }
  0x17   :  { %440 = vmatpush3.bf16.xpose.msra.mxu0 %v159_v22  ;;  %v150_v45 = vsel %vm130_vm0, %v48_v39, 0  ;;  %v47_v46 = vpack.c.bf16 %v33_v43, %v32_v42  ;;  %v30_v47 = vld [vmem:[%s695_s0] sm:$0xff]  ;;  %v31_v48 = vld [vmem:[%s695_s0 + $0x8] sm:$0xff]  ;;  %v485_v53 = vld [vmem:[%s696_s1 + $0x10] sm:$0xff]  }
  0x18   :  { %474 = vmatprep.subr.msk.bf16.mxu0 %vm130_vm0, %v50_v23  ;;  %v46_v50 = vpack.c.bf16 %v31_v48, %v30_v47  ;;  %v484_v52 = vld [vmem:[%s696_s1 + $0x8] sm:$0xff]   ;;  %v486_v54 = vld [vmem:[%s696_s1 + $0x18] sm:$0xff]   ;;  %v487_v55 = vld [vmem:[%s698_s3] sm:$0xff]  }
  0x19   :  { %254 = vperm.xlu0 %481, %v248_v28   ;;  %259 = vperm.xlu1 %482, %v249_v29   ;;  %v147_v49 = vsel %vm130_vm0, %v47_v46, 0  ;;  %v488_v28 = vld [vmem:[%s698_s3 + $0x8] sm:$0xff]   ;;  %s512_s3 = smov [#allocation3]  }
  0x1a   :  { %v144_v51 = vsel %vm130_vm0, %v46_v50, 0  ;;  %467 = vmatprep.mubr.msk.bf16.mxu1 %vm282_vm1, %v487_v55  ;;  %v385_v55 = vlaneseq  ;;  %s397_s24 = sshll.u32 %s512_s3, 4  ;;  %s398_s24 = int_to_ptr.vmem [resolvable:$true] %s397_s24 }
  0x1b   :  { %s489_s25 = scalar_lea.vmem %s398_s24, 16  ;;  %s493_s26 = scalar_lea.vmem %s398_s24, 32 }
  0x1c   :  { %p490_p0 = scmp.ne.s32.totalorder %s398_s24, %s489_s25  ;;  %p494_p1 = scmp.lt.s32.totalorder %s398_s24, %s398_s24 }
  0x1d   :  { %264 = vperm.xlu0 %481, %v250_v32   ;;  %269 = vperm.xlu1 %482, %v251_v33   ;;  %p495_p2 = scmp.lt.s32.totalorder %s493_s26, %s489_s25 }
  0x1f   :  { %442 = vmatpush3.bf16.xpose.msra.mxu0 %v156_v30  ;;  %p496_p3 = por %p495_p2, %p494_p1 }
  0x20   :  { %475 = vmatprep.subr.msk.bf16.mxu0 %vm130_vm0, %v49_v31 }
  0x21   :  { %348 = vperm.xlu0 %481, %v342_v36   ;;  %353 = vperm.xlu1 %482, %v343_v37   ;;  %p497_p4 = pnand %p496_p3, %p490_p0 }
  0x25   :  { %358 = vperm.xlu0 %481, %v344_v40   ;;  %363 = vperm.xlu1 %482, %v345_v41  }
  0x27   :  { %444 = vmatpush3.bf16.xpose.msra.mxu0 %v153_v38 }
  0x28   :  { %476 = vmatprep.subr.msk.bf16.mxu0 %vm130_vm0, %v48_v39 }
  0x29   :  { %382 = vperm.xlu0 %481, %v379_v44  }
  0x2f   :  { %446 = vmatpush3.bf16.xpose.msra.mxu0 %v150_v45 }
  0x30   :  { %477 = vmatprep.subr.msk.bf16.mxu0 %vm130_vm0, %v47_v46 }
  0x37   :  { %448 = vmatpush3.bf16.xpose.msra.mxu0 %v147_v49 }
  0x38   :  { %478 = vmatprep.subr.msk.bf16.mxu0 %vm130_vm0, %v46_v50 }
  0x3f   :  { %450 = vmatpush3.bf16.xpose.msra.mxu0 %v144_v51 }
  0x46   :  { %452 = vmatmul.mubr.msk.bf16.vlgmr.msra.gmra.mxu0 %vm130_vm0, %v484_v52 }
  0x47   :  { %455 = vmatprep.mubr.msk.bf16.mxu0 %vm130_vm0, %v485_v53 }
  0x4e   :  { %456 = vmatmul.mubr.msk.bf16.gmra.mxu0 %vm130_vm0, %v486_v54 }
  0x82   :  { %v103_v58 = vpop.permute.xlu0 %102 }
  0x83   :  { %v93_v56 = vpop.permute.xlu1 %92 }
  0x86   :  { %v108_v63 = vpop.permute.xlu0 %107 }
  0x87   :  { %v98_v61 = vpop.permute.xlu1 %97 }
  0x8c   :  { %v88_v3 = vpop.permute.xlu1 %87  ;;  %v83_v7 = vpop.permute.xlu0 %82 }
  0x90   :  { %v78_v17 = vpop.permute.xlu1 %77  ;;  %v73_v21 = vpop.permute.xlu0 %72 }
  0x94   :  { %v255_v29 = vpop.permute.xlu0 %254  ;;  %v260_v30 = vpop.permute.xlu1 %259 }
  0x98   :  { %v265_v31 = vpop.permute.xlu0 %264  ;;  %v270_v33 = vpop.permute.xlu1 %269 }
  0x9c   :  { %v349_v38 = vpop.permute.xlu0 %348  ;;  %v354_v43 = vpop.permute.xlu1 %353 }
  0xa0   :  { %v359_v49 = vpop.permute.xlu0 %358  ;;  %v364_v52 = vpop.permute.xlu1 %363 }
 0x106   :  { %v453_v57 = vpop.f32.mrf.mxu0 }
 0x107   :  { %v210_v13 = vadd.f32 %v453_v57, %v83_v7 }
 0x108   :  { %v201_v59 = vpop.f32.mrf.mxu0 }
 0x109   :  { %v234_v22 = vmax.f32 %v210_v13, 0.0  ;;  %v202_v23 = vadd.f32 %v201_v59, %v73_v21 }
 0x10a   :  { %v454_v60 = vpop.f32.mrf.mxu0 }
 0x10b   :  { %v213_v9 = vadd.f32 %v454_v60, %v88_v3  ;;  %v232_v26 = vmax.f32 %v202_v23, 0.0 }
 0x10c   :  { %v204_v62 = vpop.f32.mrf.mxu0 }
 0x10d   :  { %v235_v18 = vmax.f32 %v213_v9, 0.0  ;;  %v205_v19 = vadd.f32 %v204_v62, %v78_v17 }
 0x10e   :  { %v457_v0 = vpop.f32.mrf.mxu0 }
 0x10f   :  { %v226_v2 = vadd.f32 %v457_v0, %v103_v58  ;;  %v245_v24 = vpack.c.bf16 %v235_v18, %v234_v22  ;;  %v233_v25 = vmax.f32 %v205_v19, 0.0  ;;  %v386_v58 = vshrl.u32 %v385_v55, 7 }
 0x110   :  { %v217_v1 = vpop.f32.mrf.mxu0 }
 0x111   :  { %v218_v5 = vadd.f32 %v217_v1, %v93_v56  ;;  %v238_v10 = vmax.f32 %v226_v2, 0.0  ;;  %v244_v27 = vpack.c.bf16 %v233_v25, %v232_v26 }
 0x112   :  { %v458_v4 = vpop.f32.mrf.mxu0 }
 0x113   :  { %v229_v6 = vadd.f32 %v458_v4, %v108_v63  ;;  %v236_v14 = vmax.f32 %v218_v5, 0.0  ;;  %v383_v63 = vpop.permute.xlu0 %382 }
 0x114   :  { %v220_v8 = vpop.f32.mrf.mxu0 }
 0x115   :  { %v239_v11 = vmax.f32 %v229_v6, 0.0  ;;  %v221_v12 = vadd.f32 %v220_v8, %v98_v61  ;;  %v387_v61 = vsub.s32 0, %v386_v58 }
 0x117   :  { %v237_v15 = vmax.f32 %v221_v12, 0.0  ;;  %v247_v16 = vpack.c.bf16 %v239_v11, %v238_v10  ;;  %v388_v1 = vrot.slane %v383_v63, %v387_v61 }
 0x119   :  { %v246_v20 = vpack.c.bf16 %v237_v15, %v236_v14  ;;  %459 = vmatprep.subr.bf16.mxu1 %v247_v16 }
 0x11a   :  { %460 = vmatpush3.bf16.msra.mxu1 %v247_v16 }
 0x11b   :  { %461 = vmatprep.subr.bf16.mxu1 %v246_v20 }
 0x11e   :  { %462 = vmatpush3.bf16.msra.mxu1 %v246_v20 }
 0x11f   :  { %463 = vmatprep.subr.bf16.mxu1 %v245_v24 }
 0x122   :  { %464 = vmatpush3.bf16.msra.mxu1 %v245_v24 }
 0x123   :  { %465 = vmatprep.subr.bf16.mxu1 %v244_v27 }
 0x126   :  { %466 = vmatpush3.bf16.msra.mxu1 %v244_v27 }
 0x129   :  { %468 = vmatmul.mubr.msk.bf16.vlgmr.msra.gmra.mxu1 %vm282_vm1, %v488_v28 }
 0x1e9   :  { %v469_v32 = vpop.f32.mrf.mxu1 }
 0x1ea   :  { %v332_v37 = vadd.f32 %v469_v32, %v265_v31 }
 0x1eb   :  { %v323_v34 = vpop.f32.mrf.mxu1 }
 0x1ec   :  { %v324_v35 = vadd.f32 %v323_v34, %v255_v29  ;;  %v340_v44 = vmax.f32 %v332_v37, 0.0 }
 0x1ed   :  { %v470_v36 = vpop.f32.mrf.mxu1 }
 0x1ee   :  { %v338_v40 = vmax.f32 %v324_v35, 0.0  ;;  %v335_v41 = vadd.f32 %v470_v36, %v270_v33  ;;  %v368_v50 = vmul.f32 %v359_v49, %v340_v44 }
 0x1ef   :  { %v326_v39 = vpop.f32.mrf.mxu1 }
 0x1f0   :  { %v327_v42 = vadd.f32 %v326_v39, %v260_v30  ;;  %v366_v46 = vmul.f32 %v349_v38, %v338_v40  ;;  %v341_v47 = vmax.f32 %v335_v41, 0.0 }
 0x1f2   :  { %v339_v45 = vmax.f32 %v327_v42, 0.0  ;;  %v369_v53 = vmul.f32 %v364_v52, %v341_v47 }
 0x1f4   :  { %v367_v48 = vmul.f32 %v354_v43, %v339_v45 }
 0x1f6   :  { %v370_v51 = vadd.f32 %v367_v48, %v366_v46 }
 0x1f8   :  { %v371_v54 = vadd.f32 %v370_v51, %v368_v50 }
 0x1fa   :  { %v372_v56 = vadd.f32 %v371_v54, %v369_v53 }
 0x1fc   :  { %v373_v57 = vrot.slane %v372_v56, 4 }
 0x1fe   :  { %v374_v59 = vadd.f32 %v373_v57, %v372_v56 }
 0x200   :  { %v375_v60 = vrot.slane %v374_v59, 2 }
 0x202   :  { %v376_v62 = vadd.f32 %v375_v60, %v374_v59 }
 0x204   :  { %v377_v0 = vrot.slane %v376_v62, 1 }
 0x206   :  { %v378_v2 = vadd.f32 %v377_v0, %v376_v62 }
 0x208   :  { %v389_v3 = vadd.f32 %v388_v1, %v378_v2 }
 0x20a   :  { %390 = vst [vmem:[#allocation3] sm:$0x1] %v389_v3 }
 0x20b   :  { %500 = shalt.err (!%p497_p4)
}
 0x20c   :  { %400 = dma.vmem_to_hbm [thread:$0]  %s398_s24, 16, %s702_s7, [#allocation4]  }
 0x20d   :  { %509 = dma.done.wait [#allocation4], 16  }
 0x20e   :  { %510 = vsyncadd [#allocation4], 4294967280 }
 0x20f   :  { %404 = vsyncpa [#allocation4], 1 }

</bundles_post_ra>
